<compile_context>
chip_gen: v6e
topology: v6e:2x2x1
jax: 0.10.0
libtpu: 0.0.40
codegen_flags: <defaults>
</compile_context>

<pallas_src>
import jax
import jax.numpy as jnp
from jax.experimental import pallas as pl
from jax.experimental.pallas import tpu as pltpu

HIDDEN = 128   # nn.Linear(input_dim, 128)


def _round_up(x, m):
    return ((x + m - 1) // m) * m


def mlp_kernel(x_ref, w1_ref, b1_ref, w2_ref, b2_ref, o_ref):
    # First linear: (TB, D_in) @ (D_in, 128) + (1, 128)
    h = jnp.dot(x_ref[...], w1_ref[...], preferred_element_type=jnp.float32)
    h = h + b1_ref[...]
    # Second linear: (TB, 128) @ (128, D_out) + (1, D_out)
    y = jnp.dot(h, w2_ref[...], preferred_element_type=jnp.float32)
    y = y + b2_ref[...]
    o_ref[...] = y.astype(o_ref.dtype)


def custom_linear_model(x, w1, b1, w2, b2, *, tile_b=2048):
    """Fused 2-layer MLP forward.

    x : (B, D_in) float32
    w1: (D_in, HIDDEN)   b1: (HIDDEN,)
    w2: (HIDDEN, D_out)  b2: (D_out,)
    returns (B, D_out) float32
    """
    B, d_in = x.shape
    hidden, d_out = w2.shape

    # ---- batch tile selection ---------------------------------------------
    # Small B: a single grid step whose sublane dim is a multiple of 8 (padding
    # is bounded by 7 rows).  Large B: default 2048 (multiple of 512 -> 2x256
    # MXU-M on v6e/v7x, multiple of 128 for v5e), capped by cdiv(B,2) so the
    # grid has >= 2 steps and v7x's two TensorCores both get work on the
    # "parallel" axis.  Caller-supplied tile_b is rounded to a legal multiple.
    if B <= 256:
        tile = max(8, _round_up(B, 8))
    else:
        tile = max(256, min(_round_up(tile_b, 256),
                            _round_up(pl.cdiv(B, 2), 256)))

    grid = (pl.cdiv(B, tile),)   # ragged last block handled by Pallas (per-row math)

    b1_2d = b1.reshape(1, hidden)
    b2_2d = b2.reshape(1, d_out)

    out = pl.pallas_call(
        mlp_kernel,
        out_shape=jax.ShapeDtypeStruct((B, d_out), x.dtype),
        grid_spec=pl.GridSpec(
            grid=grid,
            in_specs=[
                pl.BlockSpec((tile, d_in), lambda i: (i, 0)),       # x tile
                pl.BlockSpec((d_in, hidden), lambda i: (0, 0)),     # W1 (resident)
                pl.BlockSpec((1, hidden), lambda i: (0, 0)),        # b1
                pl.BlockSpec((hidden, d_out), lambda i: (0, 0)),    # W2 (resident)
                pl.BlockSpec((1, d_out), lambda i: (0, 0)),         # b2
            ],
            out_specs=pl.BlockSpec((tile, d_out), lambda i: (i, 0)),
        ),
        compiler_params=pltpu.CompilerParams(
            dimension_semantics=("parallel",),
        ),
    )(x, w1, b1_2d, w2, b2_2d)

    return out


def reference(x, w1, b1, w2, b2):
    h = x @ w1 + b1
    return h @ w2 + b2


if __name__ == "__main__":
    # Small shapes consistent with the module's forward.
    batch, input_dim, output_dim = 8, 32, 16

    key = jax.random.PRNGKey(0)
    k_x, k_w1, k_b1, k_w2, k_b2 = jax.random.split(key, 5)

    x = jax.random.normal(k_x, (batch, input_dim), dtype=jnp.float32)

    # Deterministic parameter init (PyTorch nn.Linear stores W as (out, in);
    # we store the transpose (in, out) for the kernel's x @ W convention).
    scale1 = 1.0 / jnp.sqrt(jnp.float32(input_dim))
    scale2 = 1.0 / jnp.sqrt(jnp.float32(HIDDEN))
    w1 = jax.random.uniform(k_w1, (input_dim, HIDDEN), jnp.float32,
                            minval=-scale1, maxval=scale1)
    b1 = jax.random.uniform(k_b1, (HIDDEN,), jnp.float32,
                            minval=-scale1, maxval=scale1)
    w2 = jax.random.uniform(k_w2, (HIDDEN, output_dim), jnp.float32,
                            minval=-scale2, maxval=scale2)
    b2 = jax.random.uniform(k_b2, (output_dim,), jnp.float32,
                            minval=-scale2, maxval=scale2)

    out = custom_linear_model(x, w1, b1, w2, b2)
    out = jax.block_until_ready(out)

    ref = reference(x, w1, b1, w2, b2)
    assert out.shape == (batch, output_dim), out.shape
    assert jnp.allclose(out, ref, atol=1e-5, rtol=1e-5), \
        float(jnp.max(jnp.abs(out - ref)))

    print("KERNEL_OK")
</pallas_src>

<mosaic_0001>
module attributes {stable_mosaic.version = 11 : i64} {
  func.func @mlp_kernel(%arg0: i32, %arg1: memref<8x32xf32, #tpu.memory_space<vmem>>, %arg2: memref<32x128xf32, #tpu.memory_space<vmem>>, %arg3: memref<1x128xf32, #tpu.memory_space<vmem>>, %arg4: memref<128x16xf32, #tpu.memory_space<vmem>>, %arg5: memref<1x16xf32, #tpu.memory_space<vmem>>, %arg6: memref<8x16xf32, #tpu.memory_space<vmem>>) attributes {dimension_semantics = [#tpu.dimension_semantics<parallel>], iteration_bounds = array<i64: 1>, scalar_prefetch = 0 : i64, scratch_operands = 0 : i64, tpu.core_type = #tpu.core_type<tc>, window_params = [{transform_indices = @transform_0, window_bounds = array<i64: 8, 32>}, {pipeline_mode = #tpu.pipeline_mode<synchronous>, transform_indices = @transform_1, window_bounds = array<i64: 32, 128>}, {pipeline_mode = #tpu.pipeline_mode<synchronous>, transform_indices = @transform_2, window_bounds = array<i64: 1, 128>}, {pipeline_mode = #tpu.pipeline_mode<synchronous>, transform_indices = @transform_3, window_bounds = array<i64: 128, 16>}, {pipeline_mode = #tpu.pipeline_mode<synchronous>, transform_indices = @transform_4, window_bounds = array<i64: 1, 16>}, {transform_indices = @transform_5, window_bounds = array<i64: 8, 16>}]} {
    %c0 = arith.constant 0 : index
    %c0_0 = arith.constant 0 : index
    %0 = vector.load %arg1[%c0, %c0_0] : memref<8x32xf32, #tpu.memory_space<vmem>>, vector<8x32xf32>
    %c0_1 = arith.constant 0 : index
    %c0_2 = arith.constant 0 : index
    %1 = vector.load %arg2[%c0_1, %c0_2] : memref<32x128xf32, #tpu.memory_space<vmem>>, vector<32x128xf32>
    %cst = arith.constant dense<0.000000e+00> : vector<8x128xf32>
    %2 = tpu.matmul %0, %1, %cst {dimension_numbers = #tpu.dot_dimension_numbers<[1], [0], [0], [1], [0, 0, 1, 1], [], []>} : vector<8x32xf32>, vector<32x128xf32>, vector<8x128xf32> -> vector<8x128xf32>
    %c0_3 = arith.constant 0 : index
    %c0_4 = arith.constant 0 : index
    %3 = vector.load %arg3[%c0_3, %c0_4] : memref<1x128xf32, #tpu.memory_space<vmem>>, vector<1x128xf32>
    %4 = vector.broadcast %3 : vector<1x128xf32> to vector<8x128xf32>
    %5 = arith.addf %2, %4 : vector<8x128xf32>
    %c0_5 = arith.constant 0 : index
    %c0_6 = arith.constant 0 : index
    %6 = vector.load %arg4[%c0_5, %c0_6] : memref<128x16xf32, #tpu.memory_space<vmem>>, vector<128x16xf32>
    %cst_7 = arith.constant dense<0.000000e+00> : vector<8x16xf32>
    %7 = tpu.matmul %5, %6, %cst_7 {dimension_numbers = #tpu.dot_dimension_numbers<[1], [0], [0], [1], [0, 0, 1, 1], [], []>} : vector<8x128xf32>, vector<128x16xf32>, vector<8x16xf32> -> vector<8x16xf32>
    %c0_8 = arith.constant 0 : index
    %c0_9 = arith.constant 0 : index
    %8 = vector.load %arg5[%c0_8, %c0_9] : memref<1x16xf32, #tpu.memory_space<vmem>>, vector<1x16xf32>
    %9 = vector.broadcast %8 : vector<1x16xf32> to vector<8x16xf32>
    %10 = arith.addf %7, %9 : vector<8x16xf32>
    %c0_10 = arith.constant 0 : index
    %c0_11 = arith.constant 0 : index
    %11 = vector.load %arg6[%c0_10, %c0_11] : memref<8x16xf32, #tpu.memory_space<vmem>>, vector<8x16xf32>
    tpu.vector_store %arg6[%c0_10, %c0_11], %10 {strides = array<i32>} : memref<8x16xf32, #tpu.memory_space<vmem>>, vector<8x16xf32>,
    return
  }
  func.func @transform_0(%arg0: i32) -> (i32, i32) {
    %c0_i32 = arith.constant 0 : i32
    %c0_i32_0 = arith.constant 0 : i32
    return %arg0, %c0_i32 : i32, i32
  }
  func.func @transform_1(%arg0: i32) -> (i32, i32) {
    %c0_i32 = arith.constant 0 : i32
    %c0_i32_0 = arith.constant 0 : i32
    %c0_i32_1 = arith.constant 0 : i32
    return %c0_i32, %c0_i32_0 : i32, i32
  }
  func.func @transform_2(%arg0: i32) -> (i32, i32) {
    %c0_i32 = arith.constant 0 : i32
    %c0_i32_0 = arith.constant 0 : i32
    %c0_i32_1 = arith.constant 0 : i32
    return %c0_i32, %c0_i32_0 : i32, i32
  }
  func.func @transform_3(%arg0: i32) -> (i32, i32) {
    %c0_i32 = arith.constant 0 : i32
    %c0_i32_0 = arith.constant 0 : i32
    %c0_i32_1 = arith.constant 0 : i32
    return %c0_i32, %c0_i32_0 : i32, i32
  }
  func.func @transform_4(%arg0: i32) -> (i32, i32) {
    %c0_i32 = arith.constant 0 : i32
    %c0_i32_0 = arith.constant 0 : i32
    %c0_i32_1 = arith.constant 0 : i32
    return %c0_i32, %c0_i32_0 : i32, i32
  }
  func.func @transform_5(%arg0: i32) -> (i32, i32) {
    %c0_i32 = arith.constant 0 : i32
    %c0_i32_0 = arith.constant 0 : i32
    return %arg0, %c0_i32 : i32, i32
  }
}

</mosaic_0001>

<bundles_post_ra>
// kernel: tpu_custom_call.1
= control target key start
LH: loop header
LB: loop body
LE: loop exit
PB: predicated region body
PF: predicated region fallthrough
CT: control target
= control target key end

     0   :  { %v312_v1 = vmov 0.0   ;;  %vm313_vm0 = vmmov 0   ;;  %vm33_vm1 = vcmask 261120   ;;  %s441_s0 = inlined_call_operand.vmem [shape: f32[8,32], index: 0, kind: input, shape index: {}]   ;;  %s442_s1 = inlined_call_operand.vmem [shape: f32[32,128], index: 1, kind: input, shape index: {}]   ;;  %s443_s2 = inlined_call_operand.vmem [shape: f32[1,128], index: 2, kind: input, shape index: {}]   ;;  %s444_s3 = inlined_call_operand.vmem [shape: f32[128,16], index: 3, kind: input, shape index: {}]   ;;  %s445_s4 = inlined_call_operand.vmem [shape: f32[1,16], index: 4, kind: input, shape index: {}]   ;;  %s446_s5 = inlined_call_operand.hbm [shape: f32[8,16], index: 5, kind: output, shape index: {}]  }
   0x1   :  { %v25_v0 = vld [vmem:[%s442_s1 + $0x18] sm:$0xff]  ;;  %241 = vmatprep.subr.mxu0 %v312_v1  ;;  %v24_v2 = vld [vmem:[%s442_s1 + $0x10] sm:$0xff]  ;;  %249 = vmatprep.mubr.msk.f32.mxu0 %vm313_vm0, %v312_v1  ;;  %v23_v5 = vld [vmem:[%s442_s1 + $0x8] sm:$0xff] }
   0x2   :  { %v122_v3 = vld [vmem:[%s444_s3 + $0x78] sm:$0xff]  ;;  %242 = vmatpush3.msra.mxu0 %v25_v0  ;;  %252 = vmatprep.subr.mxu1 %v312_v1  ;;  %v121_v4 = vld [vmem:[%s444_s3 + $0x70] sm:$0xff]  ;;  %v120_v6 = vld [vmem:[%s444_s3 + $0x68] sm:$0xff] }
   0x3   :  { %243 = vmatprep.subr.mxu0 %v312_v1  ;;  %253 = vmatpush3.msra.mxu1 %v122_v3  ;;  %v22_v7 = vld [vmem:[%s442_s1] sm:$0xff] }
   0x4   :  { %244 = vmatpush3.msra.mxu0 %v24_v2  ;;  %254 = vmatprep.subr.mxu1 %v312_v1  ;;  %v21_v8 = vld [vmem:[%s441_s0] sm:$0xff] }
   0x5   :  { %245 = vmatprep.subr.mxu0 %v312_v1  ;;  %255 = vmatpush3.msra.mxu1 %v121_v4  ;;  %v119_v9 = vld [vmem:[%s444_s3 + $0x60] sm:$0xff] }
   0x6   :  { %246 = vmatpush3.msra.mxu0 %v23_v5  ;;  %256 = vmatprep.subr.mxu1 %v312_v1 }
   0x7   :  { %10 = vsyncpa [#allocation3], 0  ;;  %247 = vmatprep.subr.mxu0 %v312_v1  ;;  %257 = vmatpush3.msra.mxu1 %v120_v6  ;;  %v118_v10 = vld [vmem:[%s444_s3 + $0x58] sm:$0xff]  ;;  %v117_v11 = vld [vmem:[%s444_s3 + $0x50] sm:$0xff]  ;;  %s314_s11 = smov [#allocation2]   ;;  %vm200_vm2 = vcmask 130048  }
   0x8   :  { %248 = vmatpush3.msra.mxu0 %v22_v7  ;;  %258 = vmatprep.subr.mxu1 %v312_v1  ;;  %v116_v12 = vld [vmem:[%s444_s3 + $0x48] sm:$0xff]  ;;  %v115_v13 = vld [vmem:[%s444_s3 + $0x40] sm:$0xff]  ;;  %v114_v14 = vld [vmem:[%s444_s3 + $0x38] sm:$0xff]  ;;  %s208_s0 = sshll.u32 %s314_s11, 4  ;;  %s209_s0 = int_to_ptr.vmem [resolvable:$true] %s208_s0 }
   0x9   :  { %250 = vmatmul.mubr.msk.f32.vlgmr.msra.gmra.mxu0 %vm33_vm1, %v21_v8  ;;  %259 = vmatpush3.msra.mxu1 %v119_v9  ;;  %v113_v15 = vld [vmem:[%s444_s3 + $0x30] sm:$0xff]  ;;  %v112_v16 = vld [vmem:[%s444_s3 + $0x28] sm:$0xff]  ;;  %v111_v17 = vld [vmem:[%s444_s3 + $0x20] sm:$0xff]  ;;  %p295_p1 = scmp.lt.s32.totalorder %s209_s0, %s209_s0 }
   0xa   :  { %260 = vmatprep.subr.mxu1 %v312_v1  ;;  %284 = vmatprep.mubr.msk.f32.mxu1 %vm313_vm0, %v312_v1  ;;  %v110_v18 = vld [vmem:[%s444_s3 + $0x18] sm:$0xff]  ;;  %v109_v19 = vld [vmem:[%s444_s3 + $0x10] sm:$0xff]  ;;  %v108_v20 = vld [vmem:[%s444_s3 + $0x8] sm:$0xff] }
   0xb   :  { %261 = vmatpush3.msra.mxu1 %v118_v10  ;;  %v107_v21 = vld [vmem:[%s444_s3] sm:$0xff]  ;;  %s290_s3 = scalar_lea.vmem %s209_s0, 128 }
   0xc   :  { %262 = vmatprep.subr.mxu1 %v312_v1  ;;  %v216_v22 = vld [vmem:[%s443_s2] ss:$0 sm:$0xff]  ;;  %p291_p0 = scmp.ne.s32.totalorder %s209_s0, %s290_s3  ;;  %p296_p2 = scmp.lt.s32.totalorder %s290_s3, %s290_s3 }
   0xd   :  { %263 = vmatpush3.msra.mxu1 %v117_v11  ;;  %v218_v26 = vld [vmem:[%s445_s4] ss:$0 sm:$0xff] }
   0xe   :  { %264 = vmatprep.subr.mxu1 %v312_v1  ;;  %p297_p3 = por %p296_p2, %p295_p1 }
   0xf   :  { %265 = vmatpush3.msra.mxu1 %v116_v12 }
  0x10   :  { %266 = vmatprep.subr.mxu1 %v312_v1  ;;  %p298_p4 = pnand %p297_p3, %p291_p0 }
  0x11   :  { %267 = vmatpush3.msra.mxu1 %v115_v13 }
  0x12   :  { %268 = vmatprep.subr.mxu1 %v312_v1 }
  0x13   :  { %269 = vmatpush3.msra.mxu1 %v114_v14 }
  0x14   :  { %270 = vmatprep.subr.mxu1 %v312_v1 }
  0x15   :  { %271 = vmatpush3.msra.mxu1 %v113_v15 }
  0x16   :  { %272 = vmatprep.subr.mxu1 %v312_v1 }
  0x17   :  { %273 = vmatpush3.msra.mxu1 %v112_v16 }
  0x18   :  { %274 = vmatprep.subr.mxu1 %v312_v1 }
  0x19   :  { %275 = vmatpush3.msra.mxu1 %v111_v17 }
  0x1a   :  { %276 = vmatprep.subr.mxu1 %v312_v1 }
  0x1b   :  { %277 = vmatpush3.msra.mxu1 %v110_v18 }
  0x1c   :  { %278 = vmatprep.subr.mxu1 %v312_v1 }
  0x1d   :  { %279 = vmatpush3.msra.mxu1 %v109_v19 }
  0x1e   :  { %280 = vmatprep.subr.mxu1 %v312_v1 }
  0x1f   :  { %281 = vmatpush3.msra.mxu1 %v108_v20 }
  0x20   :  { %282 = vmatprep.subr.mxu1 %v312_v1 }
  0x21   :  { %283 = vmatpush3.msra.mxu1 %v107_v21 }
  0xc9   :  { %v103_v23 = vpop.f32.mrf.mxu0 }
  0xca   :  { %v104_v24 = vadd.f32 %v216_v22, %v103_v23 }
  0xcb   :  { %v251_v25 = vpop.f32.mrf.mxu0 }
  0xcc   :  { %285 = vmatmul.mubr.f32.vlgmr.msra.gmra.mxu1 %v104_v24 }
 0x18c   :  { %v196_v27 = vpop.f32.mrf.mxu1 }
 0x18d   :  { %v197_v28 = vadd.f32 %v218_v26, %v196_v27 }
 0x18e   :  { %v286_v29 = vpop.f32.mrf.mxu1 }
 0x18f   :  { %201 = vst.msk [vmem:[#allocation2] sm:$0xff] %vm200_vm2, %v197_v28 }
 0x190   :  { %301 = shalt.err (!%p298_p4)
}
 0x191   :  { %211 = dma.vmem_to_hbm [thread:$0]  %s209_s0, 128, %s446_s5, [#allocation3]  }
 0x192   :  { %310 = dma.done.wait [#allocation3], 128  }
 0x193   :  { %311 = vsyncadd [#allocation3], 4294967168 }
 0x194   :  { %215 = vsyncpa [#allocation3], 1 }

</bundles_post_ra>
